<compile_context>
chip_gen: v7x
topology: tpu7x:2x2x1
jax: 0.10.0
libtpu: 0.0.40
codegen_flags: <defaults>
</compile_context>

<pallas_src>
import functools

import jax
import jax.numpy as jnp
from jax import lax
from jax.experimental import pallas as pl
from jax.experimental.pallas import tpu as pltpu

NEG_SLOPE = 0.1  # matches UNetConvBlock(relu_slope=0.1) default


# ----------------------------------------------------------------------------
# Wrapper-side weight preparation (pure JAX, runs once per call)
# ----------------------------------------------------------------------------
def _banded_weights(dw_w, pw_w, W):
    """Compose depthwise(3x3) + pointwise(1x1) into 3 banded matmul matrices.

    Returns m of shape (3, W*Cin, W*Cout) with
      m[di, wi*Cin+ci, wo*Cout+co] = dw_w[di, wi-wo+1, ci] * pw_w[ci, co]
    for |wi - wo| <= 1, and 0 otherwise (== horizontal zero-padding).
    """
    k = jnp.einsum("ijc,cd->ijcd", dw_w, pw_w)                      # (3,3,Ci,Co)
    band = jnp.stack(
        [jnp.eye(W, k=1 - dj, dtype=k.dtype) for dj in range(3)])    # (3,W,W)
    m = jnp.einsum("jvw,ijcd->ivcwd", band, k)                       # (3,W,Ci,W,Co)
    return m.reshape(3, W * dw_w.shape[-1], W * pw_w.shape[-1])


def _blockdiag(w, W):
    """1x1 conv (Cin,Cout) -> block-diagonal (W*Cin, W*Cout) lane matrix."""
    Cin, Cout = w.shape
    m = jnp.einsum("vw,cd->vcwd", jnp.eye(W, dtype=w.dtype), w)
    return m.reshape(W * Cin, W * Cout)


def _choose_images_per_block(N, H, target_rows):
    """Whole images per grid step: sublane-aligned, prefer >=2 grid steps."""
    cands = [d for d in range(1, N + 1)
             if N % d == 0 and ((d * H) % 8 == 0 or d == N)]
    if not cands:
        cands = [N]  # full-array block is always legal
    pref = [d for d in cands if N // d >= 2 and d * H <= target_rows]
    if pref:                      # both v7x TensorCores busy + fits row target
        return max(pref)
    infit = [d for d in cands if d * H <= target_rows]
    if infit:
        return max(infit)
    return min(cands)


def _const_weight_spec(shape):
    """BlockSpec for a grid-invariant (weight) input; single-buffered."""
    index_map = lambda i: (0,) * len(shape)
    try:
        return pl.BlockSpec(shape, index_map, pipeline_mode=pl.Buffered(1))
    except (AttributeError, TypeError):   # older API without pipeline_mode
        return pl.BlockSpec(shape, index_map)


# ----------------------------------------------------------------------------
# Kernel
# ----------------------------------------------------------------------------
def unet_conv_block_kernel(x_ref, w1_ref, b1_ref, w2_ref, b2_ref, bid_ref,
                           o_ref, *, H, neg_slope):
    TR, Lout = o_ref.shape
    f32 = jnp.float32

    # Image-boundary row masks (vertical zero-padding), hoisted: (TR, 1),
    # shared by both conv stages.
    h = lax.broadcasted_iota(jnp.int32, (TR, 1), 0) % H
    not_last = (h != H - 1).astype(f32)    # src row r -> out r+1 tap valid?
    not_first = (h != 0).astype(f32)       # src row r -> out r-1 tap valid?

    def stage(res, b_ref):
        """res: (TR, >=3*Lout) fused matmul result -> LeakyReLU(conv)."""
        below = res[:, 0 * Lout:1 * Lout] * not_last     # src r -> out r+1
        center = res[:, 1 * Lout:2 * Lout]
        above = res[:, 2 * Lout:3 * Lout] * not_first    # src r -> out r-1
        y = (center + b_ref[...]
             + pltpu.roll(below, shift=1, axis=0)        # y[r] += below[r-1]
             + pltpu.roll(above, shift=TR - 1, axis=0))  # y[r] += above[r+1]
        return jnp.where(y > 0, y, neg_slope * y)        # LeakyReLU

    x = x_ref[...]                                           # (TR, Lin) bf16

    # Stage 1 + identity 1x1: one MXU pass, N = 4*Lout.
    r1 = jnp.dot(x, w1_ref[...], preferred_element_type=f32)   # (TR, 4*Lout)
    a1 = stage(r1, b1_ref)
    idn = r1[:, 3 * Lout:4 * Lout] + bid_ref[...]              # residual path

    # Stage 2: one MXU pass, N = 3*Lout.
    r2 = jnp.dot(a1.astype(w2_ref.dtype), w2_ref[...],
                 preferred_element_type=f32)                   # (TR, 3*Lout)
    a2 = stage(r2, b2_ref)

    o_ref[...] = (a2 + idn).astype(o_ref.dtype)


# ----------------------------------------------------------------------------
# Wrapper
# ----------------------------------------------------------------------------
def unet_conv_block(x, params, *, rows_per_block_target=1024):
    """x: (N, H, W, Cin) NHWC float32 -> (N, H, W, Cout)."""
    N, H, W, Cin = x.shape
    Cout = params["pw1_w"].shape[1]
    Lin, Lout = W * Cin, W * Cout
    R = N * H

    ipb = _choose_images_per_block(N, H, rows_per_block_target)
    TR = ipb * H
    grid = (R // TR,)

    f32, bf16 = jnp.float32, jnp.bfloat16
    dw1, pw1 = params["dw1_w"].astype(f32), params["pw1_w"].astype(f32)
    dw2, pw2 = params["dw2_w"].astype(f32), params["pw2_w"].astype(f32)

    m1 = _banded_weights(dw1, pw1, W)                     # (3, Lin,  Lout)
    m2 = _banded_weights(dw2, pw2, W)                     # (3, Lout, Lout)
    idm = _blockdiag(params["id_w"].astype(f32), W)       # (Lin, Lout)

    # Fuse the 3 vertical taps (and the identity 1x1) along the matmul N axis.
    w1cat = jnp.concatenate([m1[0], m1[1], m1[2], idm], axis=1).astype(bf16)
    w2cat = jnp.concatenate([m2[0], m2[1], m2[2]], axis=1).astype(bf16)

    b1 = jnp.tile(params["dw1_b"].astype(f32) @ pw1 + params["pw1_b"].astype(f32),
                  (W,)).reshape(1, Lout)
    b2 = jnp.tile(params["dw2_b"].astype(f32) @ pw2 + params["pw2_b"].astype(f32),
                  (W,)).reshape(1, Lout)
    bid = jnp.tile(params["id_b"].astype(f32), (W,)).reshape(1, Lout)

    x2d = x.reshape(R, Lin).astype(bf16)                  # lane-dense layout

    kernel = functools.partial(unet_conv_block_kernel, H=H, neg_slope=NEG_SLOPE)

    # VMEM budget from the actual block sizes (+2x headroom), capped for v7x.
    block_bytes = (2 * TR * Lin * 2          # input block, double-buffered bf16
                   + 2 * TR * Lout * 4       # output block, double-buffered f32
                   + Lin * (4 * Lout) * 2    # stage-1 fused weights (single)
                   + Lout * (3 * Lout) * 2   # stage-2 fused weights (single)
                   + 3 * Lout * 4)           # biases
    vmem_limit = int(min(48 << 20, max(16 << 20, 2 * block_bytes)))

    out2d = pl.pallas_call(
        kernel,
        out_shape=jax.ShapeDtypeStruct((R, Lout), x.dtype),
        grid=grid,
        in_specs=[
            pl.BlockSpec((TR, Lin), lambda i: (i, 0)),
            _const_weight_spec((Lin, 4 * Lout)),
            _const_weight_spec((1, Lout)),
            _const_weight_spec((Lout, 3 * Lout)),
            _const_weight_spec((1, Lout)),
            _const_weight_spec((1, Lout)),
        ],
        out_specs=pl.BlockSpec((TR, Lout), lambda i: (i, 0)),
        compiler_params=pltpu.CompilerParams(
            dimension_semantics=("parallel",),
            vmem_limit_bytes=vmem_limit),
    )(x2d, w1cat, b1, w2cat, b2, bid)

    return out2d.reshape(N, H, W, Cout)


# ----------------------------------------------------------------------------
# Pure-JAX reference (mirrors the PyTorch forward exactly, NHWC)
# ----------------------------------------------------------------------------
def ref_forward(x, params):
    def dw(h, w, b):
        f = w.reshape(3, 3, 1, w.shape[-1])
        y = lax.conv_general_dilated(
            h, f, (1, 1), "SAME",
            dimension_numbers=("NHWC", "HWIO", "NHWC"),
            feature_group_count=w.shape[-1])
        return y + b

    def pw(h, w, b):
        f = w.reshape(1, 1, *w.shape)
        y = lax.conv_general_dilated(
            h, f, (1, 1), "SAME",
            dimension_numbers=("NHWC", "HWIO", "NHWC"))
        return y + b

    lrelu = lambda y: jnp.where(y > 0, y, NEG_SLOPE * y)
    out = lrelu(pw(dw(x, params["dw1_w"], params["dw1_b"]),
                   params["pw1_w"], params["pw1_b"]))
    out = lrelu(pw(dw(out, params["dw2_w"], params["dw2_b"]),
                   params["pw2_w"], params["pw2_b"]))
    return out + pw(x, params["id_w"], params["id_b"])


def init_params(key, in_cnum, out_cnum):
    ks = jax.random.split(key, 10)
    scale = 0.1
    return {
        "dw1_w": scale * jax.random.normal(ks[0], (3, 3, in_cnum), jnp.float32),
        "dw1_b": scale * jax.random.normal(ks[1], (in_cnum,), jnp.float32),
        "pw1_w": scale * jax.random.normal(ks[2], (in_cnum, out_cnum), jnp.float32),
        "pw1_b": scale * jax.random.normal(ks[3], (out_cnum,), jnp.float32),
        "dw2_w": scale * jax.random.normal(ks[4], (3, 3, out_cnum), jnp.float32),
        "dw2_b": scale * jax.random.normal(ks[5], (out_cnum,), jnp.float32),
        "pw2_w": scale * jax.random.normal(ks[6], (out_cnum, out_cnum), jnp.float32),
        "pw2_b": scale * jax.random.normal(ks[7], (out_cnum,), jnp.float32),
        "id_w": scale * jax.random.normal(ks[8], (in_cnum, out_cnum), jnp.float32),
        "id_b": scale * jax.random.normal(ks[9], (out_cnum,), jnp.float32),
    }


if __name__ == "__main__":
    key = jax.random.PRNGKey(0)
    kx, kp = jax.random.split(key)

    N, H, W = 2, 16, 16
    in_cnum, out_cnum = 4, 8

    # NHWC input (PyTorch NCHW (2,4,16,16) transposed to (2,16,16,4))
    x = jax.random.normal(kx, (N, H, W, in_cnum), jnp.float32)
    params = init_params(kp, in_cnum, out_cnum)

    out = unet_conv_block(x, params)
    out = jax.block_until_ready(out)

    ref = ref_forward(x, params)
    assert out.shape == (N, H, W, out_cnum)
    # Tolerance covers bf16 MXU operands + composed-weight rounding vs the f32
    # lax.conv reference; real layout/mask/shift bugs produce errors >= 1e-1.
    err = float(jnp.max(jnp.abs(out - ref)))
    assert jnp.allclose(out, ref, rtol=3e-2, atol=3e-2), f"max abs err {err}"

    print("KERNEL_OK")
</pallas_src>

<mosaic_0001>
module attributes {stable_mosaic.version = 11 : i64} {
  func.func @unet_conv_block_kernel(%arg0: i32, %arg1: memref<16x64xbf16, #tpu.memory_space<vmem>>, %arg2: memref<64x512xbf16, #tpu.memory_space<vmem>>, %arg3: memref<1x128xf32, #tpu.memory_space<vmem>>, %arg4: memref<128x384xbf16, #tpu.memory_space<vmem>>, %arg5: memref<1x128xf32, #tpu.memory_space<vmem>>, %arg6: memref<1x128xf32, #tpu.memory_space<vmem>>, %arg7: memref<16x128xf32, #tpu.memory_space<vmem>>) attributes {dimension_semantics = [#tpu.dimension_semantics<parallel>], iteration_bounds = array<i64: 2>, scalar_prefetch = 0 : i64, scratch_operands = 0 : i64, tpu.core_type = #tpu.core_type<tc>, window_params = [{transform_indices = @transform_0, window_bounds = array<i64: 16, 64>}, {pipeline_mode = #tpu.pipeline_mode<synchronous>, transform_indices = @transform_1, window_bounds = array<i64: 64, 512>}, {pipeline_mode = #tpu.pipeline_mode<synchronous>, transform_indices = @transform_2, window_bounds = array<i64: 1, 128>}, {pipeline_mode = #tpu.pipeline_mode<synchronous>, transform_indices = @transform_3, window_bounds = array<i64: 128, 384>}, {pipeline_mode = #tpu.pipeline_mode<synchronous>, transform_indices = @transform_4, window_bounds = array<i64: 1, 128>}, {pipeline_mode = #tpu.pipeline_mode<synchronous>, transform_indices = @transform_5, window_bounds = array<i64: 1, 128>}, {transform_indices = @transform_6, window_bounds = array<i64: 16, 128>}]} {
    %0 = tpu.iota {dimensions = array<i32: 0>} : vector<16x1xi32>
    %c16_i32 = arith.constant 16 : i32
    %c0_i32 = arith.constant 0 : i32
    %1 = arith.cmpi eq, %c16_i32, %c0_i32 : i32
    %c1_i32 = arith.constant 1 : i32
    %2 = arith.select %1, %c1_i32, %c16_i32 : i32
    %3 = vector.broadcast %2 : i32 to vector<16x1xi32>
    %4 = arith.remsi %0, %3 : vector<16x1xi32>
    %c0_i32_0 = arith.constant 0 : i32
    %5 = vector.broadcast %c0_i32_0 : i32 to vector<16x1xi32>
    %6 = arith.cmpi ne, %4, %5 : vector<16x1xi32>
    %c0_i32_1 = arith.constant 0 : i32
    %7 = vector.broadcast %c0_i32_1 : i32 to vector<16x1xi32>
    %8 = arith.cmpi slt, %4, %7 : vector<16x1xi32>
    %c0_i32_2 = arith.constant 0 : i32
    %9 = arith.cmpi slt, %2, %c0_i32_2 : i32
    %10 = vector.broadcast %9 : i1 to vector<16x1xi1>
    %11 = vector.broadcast %10 : vector<16x1xi1> to vector<16x1xi1>
    %12 = arith.xori %8, %11 : vector<16x1xi1>
    %13 = arith.andi %12, %6 : vector<16x1xi1>
    %14 = vector.broadcast %2 : i32 to vector<16x1xi32>
    %15 = arith.addi %4, %14 : vector<16x1xi32>
    %16 = arith.select %13, %15, %4 : vector<16x1xi1>, vector<16x1xi32>
    %c15_i32 = arith.constant 15 : i32
    %17 = vector.broadcast %c15_i32 : i32 to vector<16x1xi32>
    %18 = arith.cmpi ne, %16, %17 : vector<16x1xi32>
    %19 = arith.extui %18 : vector<16x1xi1> to vector<16x1xi32>
    %20 = arith.sitofp %19 : vector<16x1xi32> to vector<16x1xf32>
    %c0_i32_3 = arith.constant 0 : i32
    %21 = vector.broadcast %c0_i32_3 : i32 to vector<16x1xi32>
    %22 = arith.cmpi ne, %16, %21 : vector<16x1xi32>
    %23 = arith.extui %22 : vector<16x1xi1> to vector<16x1xi32>
    %24 = arith.sitofp %23 : vector<16x1xi32> to vector<16x1xf32>
    %c0 = arith.constant 0 : index
    %c0_4 = arith.constant 0 : index
    %25 = vector.load %arg1[%c0, %c0_4] : memref<16x64xbf16, #tpu.memory_space<vmem>>, vector<16x64xbf16>
    %c0_5 = arith.constant 0 : index
    %c0_6 = arith.constant 0 : index
    %26 = vector.load %arg2[%c0_5, %c0_6] : memref<64x512xbf16, #tpu.memory_space<vmem>>, vector<64x512xbf16>
    %cst = arith.constant dense<0.000000e+00> : vector<16x512xf32>
    %27 = tpu.matmul %25, %26, %cst {dimension_numbers = #tpu.dot_dimension_numbers<[1], [0], [0], [1], [0, 0, 1, 1], [], []>} : vector<16x64xbf16>, vector<64x512xbf16>, vector<16x512xf32> -> vector<16x512xf32>
    %28 = vector.extract_strided_slice %27 {offsets = [0, 0], sizes = [16, 128], strides = [1, 1]} : vector<16x512xf32> to vector<16x128xf32>
    %29 = vector.broadcast %20 : vector<16x1xf32> to vector<16x128xf32>
    %30 = arith.mulf %28, %29 : vector<16x128xf32>
    %31 = vector.extract_strided_slice %27 {offsets = [0, 128], sizes = [16, 128], strides = [1, 1]} : vector<16x512xf32> to vector<16x128xf32>
    %32 = vector.extract_strided_slice %27 {offsets = [0, 256], sizes = [16, 128], strides = [1, 1]} : vector<16x512xf32> to vector<16x128xf32>
    %33 = vector.broadcast %24 : vector<16x1xf32> to vector<16x128xf32>
    %34 = arith.mulf %32, %33 : vector<16x128xf32>
    %c0_7 = arith.constant 0 : index
    %c0_8 = arith.constant 0 : index
    %35 = vector.load %arg3[%c0_7, %c0_8] : memref<1x128xf32, #tpu.memory_space<vmem>>, vector<1x128xf32>
    %36 = vector.broadcast %35 : vector<1x128xf32> to vector<16x128xf32>
    %37 = arith.addf %31, %36 : vector<16x128xf32>
    %c1_i32_9 = arith.constant 1 : i32
    %38 = tpu.dynamic_rotate %30 by %c1_i32_9 dim 0 : vector<16x128xf32>, i32 -> vector<16x128xf32>
    %39 = arith.addf %37, %38 : vector<16x128xf32>
    %c15_i32_10 = arith.constant 15 : i32
    %40 = tpu.dynamic_rotate %34 by %c15_i32_10 dim 0 : vector<16x128xf32>, i32 -> vector<16x128xf32>
    %41 = arith.addf %39, %40 : vector<16x128xf32>
    %cst_11 = arith.constant 0.000000e+00 : f32
    %42 = vector.broadcast %cst_11 : f32 to vector<16x128xf32>
    %43 = arith.cmpf ogt, %41, %42 : vector<16x128xf32>
    %cst_12 = arith.constant 1.000000e-01 : f32
    %44 = vector.broadcast %cst_12 : f32 to vector<16x128xf32>
    %45 = arith.mulf %44, %41 : vector<16x128xf32>
    %46 = arith.select %43, %41, %45 : vector<16x128xi1>, vector<16x128xf32>
    %47 = vector.extract_strided_slice %27 {offsets = [0, 384], sizes = [16, 128], strides = [1, 1]} : vector<16x512xf32> to vector<16x128xf32>
    %c0_13 = arith.constant 0 : index
    %c0_14 = arith.constant 0 : index
    %48 = vector.load %arg6[%c0_13, %c0_14] : memref<1x128xf32, #tpu.memory_space<vmem>>, vector<1x128xf32>
    %49 = vector.broadcast %48 : vector<1x128xf32> to vector<16x128xf32>
    %50 = arith.addf %47, %49 : vector<16x128xf32>
    %51 = arith.truncf %46 : vector<16x128xf32> to vector<16x128xbf16>
    %c0_15 = arith.constant 0 : index
    %c0_16 = arith.constant 0 : index
    %52 = vector.load %arg4[%c0_15, %c0_16] : memref<128x384xbf16, #tpu.memory_space<vmem>>, vector<128x384xbf16>
    %cst_17 = arith.constant dense<0.000000e+00> : vector<16x384xf32>
    %53 = tpu.matmul %51, %52, %cst_17 {dimension_numbers = #tpu.dot_dimension_numbers<[1], [0], [0], [1], [0, 0, 1, 1], [], []>} : vector<16x128xbf16>, vector<128x384xbf16>, vector<16x384xf32> -> vector<16x384xf32>
    %54 = vector.extract_strided_slice %53 {offsets = [0, 0], sizes = [16, 128], strides = [1, 1]} : vector<16x384xf32> to vector<16x128xf32>
    %55 = vector.broadcast %20 : vector<16x1xf32> to vector<16x128xf32>
    %56 = arith.mulf %54, %55 : vector<16x128xf32>
    %57 = vector.extract_strided_slice %53 {offsets = [0, 128], sizes = [16, 128], strides = [1, 1]} : vector<16x384xf32> to vector<16x128xf32>
    %58 = vector.extract_strided_slice %53 {offsets = [0, 256], sizes = [16, 128], strides = [1, 1]} : vector<16x384xf32> to vector<16x128xf32>
    %59 = vector.broadcast %24 : vector<16x1xf32> to vector<16x128xf32>
    %60 = arith.mulf %58, %59 : vector<16x128xf32>
    %c0_18 = arith.constant 0 : index
    %c0_19 = arith.constant 0 : index
    %61 = vector.load %arg5[%c0_18, %c0_19] : memref<1x128xf32, #tpu.memory_space<vmem>>, vector<1x128xf32>
    %62 = vector.broadcast %61 : vector<1x128xf32> to vector<16x128xf32>
    %63 = arith.addf %57, %62 : vector<16x128xf32>
    %c1_i32_20 = arith.constant 1 : i32
    %64 = tpu.dynamic_rotate %56 by %c1_i32_20 dim 0 : vector<16x128xf32>, i32 -> vector<16x128xf32>
    %65 = arith.addf %63, %64 : vector<16x128xf32>
    %c15_i32_21 = arith.constant 15 : i32
    %66 = tpu.dynamic_rotate %60 by %c15_i32_21 dim 0 : vector<16x128xf32>, i32 -> vector<16x128xf32>
    %67 = arith.addf %65, %66 : vector<16x128xf32>
    %cst_22 = arith.constant 0.000000e+00 : f32
    %68 = vector.broadcast %cst_22 : f32 to vector<16x128xf32>
    %69 = arith.cmpf ogt, %67, %68 : vector<16x128xf32>
    %cst_23 = arith.constant 1.000000e-01 : f32
    %70 = vector.broadcast %cst_23 : f32 to vector<16x128xf32>
    %71 = arith.mulf %70, %67 : vector<16x128xf32>
    %72 = arith.select %69, %67, %71 : vector<16x128xi1>, vector<16x128xf32>
    %73 = arith.addf %72, %50 : vector<16x128xf32>
    %c0_24 = arith.constant 0 : index
    %c0_25 = arith.constant 0 : index
    %74 = vector.load %arg7[%c0_24, %c0_25] : memref<16x128xf32, #tpu.memory_space<vmem>>, vector<16x128xf32>
    tpu.vector_store %arg7[%c0_24, %c0_25], %73 {strides = array<i32>} : memref<16x128xf32, #tpu.memory_space<vmem>>, vector<16x128xf32>,
    return
  }
  func.func @transform_0(%arg0: i32) -> (i32, i32) {
    %c0_i32 = arith.constant 0 : i32
    %c0_i32_0 = arith.constant 0 : i32
    return %arg0, %c0_i32 : i32, i32
  }
  func.func @transform_1(%arg0: i32) -> (i32, i32) {
    %c0_i32 = arith.constant 0 : i32
    %c0_i32_0 = arith.constant 0 : i32
    %c0_i32_1 = arith.constant 0 : i32
    return %c0_i32, %c0_i32_0 : i32, i32
  }
  func.func @transform_2(%arg0: i32) -> (i32, i32) {
    %c0_i32 = arith.constant 0 : i32
    %c0_i32_0 = arith.constant 0 : i32
    %c0_i32_1 = arith.constant 0 : i32
    return %c0_i32, %c0_i32_0 : i32, i32
  }
  func.func @transform_3(%arg0: i32) -> (i32, i32) {
    %c0_i32 = arith.constant 0 : i32
    %c0_i32_0 = arith.constant 0 : i32
    %c0_i32_1 = arith.constant 0 : i32
    return %c0_i32, %c0_i32_0 : i32, i32
  }
  func.func @transform_4(%arg0: i32) -> (i32, i32) {
    %c0_i32 = arith.constant 0 : i32
    %c0_i32_0 = arith.constant 0 : i32
    %c0_i32_1 = arith.constant 0 : i32
    return %c0_i32, %c0_i32_0 : i32, i32
  }
  func.func @transform_5(%arg0: i32) -> (i32, i32) {
    %c0_i32 = arith.constant 0 : i32
    %c0_i32_0 = arith.constant 0 : i32
    %c0_i32_1 = arith.constant 0 : i32
    return %c0_i32, %c0_i32_0 : i32, i32
  }
  func.func @transform_6(%arg0: i32) -> (i32, i32) {
    %c0_i32 = arith.constant 0 : i32
    %c0_i32_0 = arith.constant 0 : i32
    return %arg0, %c0_i32 : i32, i32
  }
}

</mosaic_0001>

<bundles_post_ra>
// kernel: tpu_custom_call.1
= control target key start
LH: loop header
LB: loop body
LE: loop exit
PB: predicated region body
PF: predicated region fallthrough
CT: control target
= control target key end

     0   :  { %11 = vsyncpa [#allocation3], 0  ;;  %s1685_s0 = inlined_call_operand.hbm [shape: bf16[32,64], index: 0, kind: input, shape index: {}]   ;;  %s1686_s1 = inlined_call_operand.hbm [shape: bf16[64,512], index: 1, kind: input, shape index: {}]   ;;  %s1687_s2 = inlined_call_operand.vmem [shape: f32[1,128], index: 2, kind: input, shape index: {}]   ;;  %s1688_s3 = inlined_call_operand.hbm [shape: bf16[128,384], index: 3, kind: input, shape index: {}]   ;;  %s1689_s4 = inlined_call_operand.vmem [shape: f32[1,128], index: 4, kind: input, shape index: {}]   ;;  %s1690_s5 = inlined_call_operand.vmem [shape: f32[1,128], index: 5, kind: input, shape index: {}]   ;;  %s1691_s6 = inlined_call_operand.hbm [shape: f32[32,128], index: 6, kind: output, shape index: {}]  }
   0x1   :  { %13 = vsyncpa [#allocation3 + $0x1], 0 }
   0x2   :  { %14 = vsyncpa [#allocation6], 0 }
   0x3   :  { %15 = vsyncpa [#allocation4], 0 }
   0x4   :  { %17 = vsyncpa [#allocation4 + $0x1], 0  ;;  %s1402_s21 = smov 0   ;;  %s1404_s22 = smov 0  }
   0x5   :  { %s1406_s23 = smov 0   ;;  %s1408_s24 = smov 0  }
   0x6 LB: > { %s1423_s25 = sadd.s32 4294967295, %s1350_s24   ;;  %s962_s26 = sadd.s32 4294967294, %s1350_s24   ;;  %s1350_s24 = sphi %s1408_s24, %s1711_s24   ;;  %s1346_s23 = sphi %s1406_s23, %s1710_s23   ;;  %s1342_s22 = sphi %s1404_s22, %s1709_s22   ;;  %s1338_s21 = sphi %s1402_s21, %s1708_s21  }
   0x7   : > { %p43_p0 = scmp.ne.s32.totalorder %s1342_s22, %s1338_s21  ;;  %p1692_p1 = scmp.eq.s32.totalorder %s1423_s25, 0 }
   0x8   : > { %p178_p3 = scmp.eq.s32.totalorder %s962_s26, 1  ;;  %p963_p5 = scmp.ge.s32.totalorder %s1350_s24, 1 }
   0x9   : > { %p1432_p4 = por %p1692_p1, %p43_p0  ;;  %p185_p7 = scmp.lt.s32.totalorder %s1350_s24, 3 }
   0xa   : > { %p1437_p6 = por %p178_p3, %p43_p0  ;;  %s1352_s30 = smov [#allocation5]  }
   0xb   : > { %s1695_s27 = scalar_select %p1432_p4, 1, 0 }
   0xc   : > { %s1696_s28 = scalar_select %p1437_p6, 1, 0 }
   0xd   : > { %p1442_p8 = pnand %p963_p5, %p185_p7  ;;  %s197_s7 = sshll.u32 %s1352_s30, 4  ;;  %s1446_s7 = int_to_ptr.vmem [resolvable:$true] %s197_s7 }
   0xe   : > { %s1353_s9 = smov [#allocation7]   ;;  %s1194_s13 = scalar_lea.hbm %s1686_s1, 2048 }
   0xf   : > { %p1071_p9 = pneg %p1442_p8  ;;  %s213_s10 = sshll.u32 %s1353_s9, 4  ;;  %s1457_s10 = int_to_ptr.vmem [resolvable:$true] %s213_s10 }
  0x10   : > { %p1195_p12 = scmp.ne.s32.totalorder %s1686_s1, %s1194_s13  ;;  %p1201_p5 = scmp.lt.u32.totalorder %s1194_s13, %s1686_s1 }
  0x11   : > { %p1453_p11 = pnand %p1071_p9, %p1692_p1 }
  0x13   : > { %p1196_p13 = pneg %p1453_p11 }
  0x15   : > { %p1197_p0 = pnand %p1196_p13, %p1195_p12 }
  0x17   : > { %p1198_p3 = pneg %p1197_p0 }
  0x19   : > { %p1203_p7 = pnand %p1201_p5, %p1198_p3 }
  0x1b   : > { %1206 = shalt.err (!%p1203_p7)
}
  0x1c   : > { %s1207_s18 = scalar_lea.vmem %s1446_s7, 2048  ;;  %p1215_p2 = scmp.lt.s32.totalorder %s1446_s7, %s1446_s7 }
  0x1d   : > { %p1208_p9 = scmp.ne.s32.totalorder %s1446_s7, %s1207_s18  ;;  %p1216_p12 = scmp.lt.s32.totalorder %s1207_s18, %s1207_s18 }
  0x1f   : > { %p1210_p10 = pnand %p1208_p9, %p1196_p13  ;;  %p1217_p0 = por %p1216_p12, %p1215_p2 }
  0x21   : > { %p1211_p1 = pneg %p1210_p10 }
  0x23   : > { %p1218_p6 = pnand %p1217_p0, %p1211_p1 }
  0x25   : > { %1221 = shalt.err (!%p1218_p6)
}
  0x26   : > { %s1354_s19 = smov 256   ;;  %s1355_s20 = smov 16  }
  0x27   : > { %1074 = dma.hbm_to_vmem [thread:$0]  (!%p1453_p11), %s1686_s1, 2048, %s1446_s7, [#allocation6], %s1354_s19, %s1354_s19, %s1355_s20  }
  0x28   : > { %s1222_s12 = scalar_lea.hbm %s1688_s3, 3072 }
  0x29   : > { %p1223_p2 = scmp.ne.s32.totalorder %s1688_s3, %s1222_s12  ;;  %p1229_p10 = scmp.lt.u32.totalorder %s1222_s12, %s1688_s3 }
  0x2b   : > { %p1225_p1 = pnand %p1223_p2, %p1196_p13 }
  0x2d   : > { %p1226_p6 = pneg %p1225_p1 }
  0x2f   : > { %p1231_p3 = pnand %p1229_p10, %p1226_p6 }
  0x31   : > { %1234 = shalt.err (!%p1231_p3)
}
  0x32   : > { %s1235_s7 = scalar_lea.vmem %s1457_s10, 3072  ;;  %p1243_p12 = scmp.lt.s32.totalorder %s1457_s10, %s1457_s10 }
  0x33   : > { %p1236_p5 = scmp.ne.s32.totalorder %s1457_s10, %s1235_s7  ;;  %p1244_p0 = scmp.lt.s32.totalorder %s1235_s7, %s1235_s7 }
  0x35   : > { %p1238_p7 = pnand %p1236_p5, %p1196_p13  ;;  %p1245_p2 = por %p1244_p0, %p1243_p12 }
  0x37   : > { %p1239_p9 = pneg %p1238_p7 }
  0x39   : > { %p1246_p1 = pnand %p1245_p2, %p1239_p9 }
  0x3b   : > { %1249 = shalt.err (!%p1246_p1)
}
  0x3c   : > { %s1356_s17 = smov 192   ;;  %s1357_s18 = smov 12  }
  0x3d   : > { %1077 = dma.hbm_to_vmem [thread:$0]  (!%p1453_p11), %s1688_s3, 3072, %s1457_s10, [#allocation6], %s1356_s17, %s1356_s17, %s1357_s18  }
  0x3e   : > { %s1512_s26 = sadd.s32 1, %s1350_s24   ;;  %s30_s9 = sadd.s32 1, %s1346_s23 }
  0x3f   : > { %s27_s30 = ssub.s32 %s1350_s24, %s1512_s26  ;;  %p37_p6 = scmp.ne.s32.totalorder %s1346_s23, %s1342_s22 }
  0x40   : > { %p28_p13 = scmp.eq.s32.totalorder %s27_s30, 0  ;;  %p38_p10 = scmp.eq.s32.totalorder %s1350_s24, 0 }
  0x41   : > { %p1699_p5 = scmp.eq.s32.totalorder %s1423_s25, 1  ;;  %p1088_p9 = scmp.lt.s32.totalorder %s1350_s24, 2 }
  0x42   : > { %s1521_s11 = scalar_select %p28_p13, %s1346_s23, %s30_s9  }
  0x43   : > { %p39_p3 = por %p38_p10, %p37_p6  ;;  %p1525_p7 = por %p1699_p5, %p37_p6 }
  0x44   : > { %s233_s8 = sand.u32 1, %s1346_s23   ;;  %s1028_s10 = sshll.u32 %s1350_s24, 7 }
  0x45   : > { %s1700_s12 = scalar_select %p1525_p7, 1, 0 }
  0x46   : > { %s967_s13 = sshll.u32 %s233_s8, 3  ;;  %s1535_s16 = scalar_lea.hbm %s1685_s0, %s1028_s10 }
  0x47   : > { %s237_s7 = scalar_lea.vmem [#allocation2], %s967_s13  ;;  %p1539_p11 = pnand %p1088_p9, %p39_p3 }
  0x48   : > { %s244_s17 = sshll.u32 %s237_s7, 4  ;;  %s1543_s19 = scalar_lea.sflag [#allocation3], %s233_s8  ;;  %s1537_s17 = int_to_ptr.vmem [resolvable:$true] %s244_s17 }
  0x49   : > { %s1250_s20 = scalar_lea.hbm %s1535_s16, 128  ;;  %p1252_p0 = pneg %p1539_p11 }
  0x4a   : > { %p1251_p12 = scmp.ne.s32.totalorder %s1535_s16, %s1250_s20  ;;  %s1255_s13 = scalar_lea.hbm %s1685_s0, 256 }
  0x4b   : > { %p1256_p13 = scmp.lt.u32.totalorder %s1535_s16, %s1685_s0  ;;  %p1257_p6 = scmp.lt.u32.totalorder %s1255_s13, %s1250_s20 }
  0x4c   : > { %p1253_p2 = pnand %p1252_p0, %p1251_p12  ;;  %p1259_p3 = scmp.lt.u32.totalorder %s1250_s20, %s1535_s16 }
  0x4d   : > { %p1258_p10 = por %p1257_p6, %p1256_p13 }
  0x4e   : > { %p1254_p1 = pneg %p1253_p2 }
  0x4f   : > { %p1260_p5 = por %p1259_p3, %p1258_p10 }
  0x51   : > { %p1261_p9 = pnand %p1260_p5, %p1254_p1 }
  0x53   : > { %1264 = shalt.err (!%p1261_p9)
}
  0x54   : > { %s1265_s8 = scalar_lea.vmem %s1537_s17, 128  ;;  %s1358_s15 = smov [#allocation2]  }
  0x55   : > { %p1266_p12 = scmp.ne.s32.totalorder %s1537_s17, %s1265_s8  ;;  %s1270_s7 = sshll.u32 %s1358_s15, 4  ;;  %s1271_s7 = int_to_ptr.vmem [resolvable:$false] %s1270_s7 }
  0x56   : > { %s1272_s30 = scalar_lea.vmem %s1271_s7, 256  ;;  %p1273_p4 = scmp.lt.s32.totalorder %s1537_s17, %s1271_s7 }
  0x57   : > { %p1268_p2 = pnand %p1266_p12, %p1252_p0  ;;  %p1274_p13 = scmp.lt.s32.totalorder %s1272_s30, %s1265_s8 }
  0x59   : > { %p1269_p7 = pneg %p1268_p2  ;;  %p1275_p6 = por %p1274_p13, %p1273_p4 }
  0x5b   : > { %p1276_p10 = pnand %p1275_p6, %p1269_p7 }
  0x5d   : > { %1279 = shalt.err (!%p1276_p10)
}
  0x5e   : > { %s1359_s20 = smov 64   ;;  %s1360_s9 = smov 4  }
  0x5f   : > { %1081 = dma.hbm_to_vmem [thread:$0]  (!%p1539_p11), %s1535_s16, 128, %s1537_s17, %s1543_s19, %s1359_s20, %s1359_s20, %s1360_s9  }
  0x60   : > { %256 = sbr.rel (%p1442_p8) target bundleno = 596 (0x254), region = 44  ;;  %s1574_s13 = sand.u32 (!%p1442_p8), 1, %s1342_s22  }
  0x61   : > { %s971_s10 = sshll.u32 (!%p1442_p8), %s1574_s13, 3  ;;  %s259_s14 = scalar_lea.sflag (!%p1442_p8), [#allocation3], %s1574_s13 }
  0x62   : > { %s1578_s8 = scalar_lea.vmem (!%p1442_p8), [#allocation2], %s971_s10  ;;  %p1702_p4 = scmp.ne.s32.totalorder (!%p1442_p8), %s1695_s27, 0 }
  0x67   : > { %1325 = dma.done.wait (%p1702_p4), %s259_s14, 128  }
  0x68   : > { %1327 = vsyncadd (%p1702_p4), %s259_s14, 4294967168  ;;  %p1703_p7 = scmp.eq.s32.totalorder %s1423_s25, 0 }
  0x6a   : > { %1329 = dma.done.wait (%p1703_p7), [#allocation6], 5120   ;;  %p1704_p8 = pmov %p1703_p7 }
  0x6b   : > { %v1361_v0 = vmov 0   ;;  %v1137_v1 = vld [vmem:[#allocation5 + $0x4] ss:$16 sps:$4 sm:$0xff]   ;;  %v1139_v2 = vld [vmem:[#allocation5] ss:$16 sps:$4 sm:$0xff]   ;;  %vm444_vm0 = vcmask 523264   ;;  %v302_v43 = vlaneseq }
  0x6c   : > { %1331 = vsyncadd (%p1704_p8), [#allocation6], 4294962176  ;;  %480 = vmatprep.mubr.bf16.mxu0 %v1361_v0  ;;  %523 = vmatprep.mubr.bf16.mxu1 %v1361_v0  ;;  %v1140_v3 = vld [vmem:[#allocation5 + $0xc] ss:$16 sps:$4 sm:$0xff]   ;;  %v1142_v4 = vld [vmem:[#allocation5 + $0x8] ss:$16 sps:$4 sm:$0xff]  }
  0x6d   : > { %448 = vmatprep.subr.bf16.mxu0 %v1137_v1  ;;  %v1143_v5 = vld [vmem:[#allocation5 + $0x24] ss:$16 sps:$4 sm:$0xff]   ;;  %v1145_v6 = vld [vmem:[#allocation5 + $0x20] ss:$16 sps:$4 sm:$0xff]   ;;  %491 = vmatprep.subr.bf16.mxu1 %v1140_v3  ;;  %v1146_v7 = vld [vmem:[#allocation5 + $0x2c] ss:$16 sps:$4 sm:$0xff]  }
  0x6e   : > { %449 = vmatpush1.bf16.msra.mxu0 %v1139_v2  ;;  %492 = vmatpush1.bf16.msra.mxu1 %v1142_v4  ;;  %v1148_v8 = vld [vmem:[#allocation5 + $0x28] ss:$16 sps:$4 sm:$0xff]   ;;  %v1149_v9 = vld [vmem:[#allocation5 + $0x44] ss:$16 sps:$4 sm:$0xff]   ;;  %v1151_v10 = vld [vmem:[#allocation5 + $0x40] ss:$16 sps:$4 sm:$0xff]  }
  0x6f   : > { %450 = vmatprep.subr.bf16.mxu0 %v1143_v5  ;;  %493 = vmatprep.subr.bf16.mxu1 %v1146_v7  ;;  %v1152_v11 = vld [vmem:[#allocation5 + $0x4c] ss:$16 sps:$4 sm:$0xff]   ;;  %v1155_v12 = vld [vmem:[#allocation5 + $0x64] ss:$16 sps:$4 sm:$0xff]   ;;  %v1154_v13 = vld [vmem:[#allocation5 + $0x48] ss:$16 sps:$4 sm:$0xff]  }
  0x70   : > { %v1158_v14 = vld [vmem:[#allocation5 + $0x6c] ss:$16 sps:$4 sm:$0xff]   ;;  %v1157_v15 = vld [vmem:[#allocation5 + $0x60] ss:$16 sps:$4 sm:$0xff]   ;;  %v1160_v17 = vld [vmem:[#allocation5 + $0x68] ss:$16 sps:$4 sm:$0xff]  }
  0x71   : > { %v1164_v16 = vld [vmem:[#allocation7 + $0x4] ss:$12 sps:$4 sm:$0xff]   ;;  %v1162_v19 = vld [vmem:[#allocation7] ss:$12 sps:$4 sm:$0xff]   ;;  %v1168_v20 = vld [vmem:[#allocation7 + $0x1c] ss:$12 sps:$4 sm:$0xff]  }
  0x72   : > { %451 = vmatpush1.bf16.msra.mxu0 %v1145_v6  ;;  %494 = vmatpush1.bf16.msra.mxu1 %v1148_v8  ;;  %v1161_v18 = vld [vmem:[%s1578_s8] sm:$0xff]   ;;  %v1362_v22 = vmov 0.0   ;;  %v1169_v24 = vld [vmem:[#allocation7 + $0x20] ss:$12 sps:$4 sm:$0xff]   ;;  %vm1363_vm1 = vmmov 0   ;;  %v1598_v44 = vshrl.u32 %v302_v43, 7 }
  0x73   : > { %452 = vmatprep.subr.bf16.mxu0 %v1149_v9  ;;  %495 = vmatprep.subr.bf16.mxu1 %v1152_v11  ;;  %v1165_v21 = vld [vmem:[#allocation7 + $0x8] ss:$12 sps:$4 sm:$0xff]   ;;  %v1166_v23 = vld [vmem:[#allocation7 + $0x18] ss:$12 sps:$4 sm:$0xff]   ;;  %v1170_v26 = vld [vmem:[#allocation7 + $0x30] ss:$12 sps:$4 sm:$0xff]  }
  0x74   : > { %v1172_v25 = vld [vmem:[#allocation7 + $0x34] ss:$12 sps:$4 sm:$0xff]   ;;  %v1176_v27 = vld [vmem:[#allocation7 + $0x4c] ss:$12 sps:$4 sm:$0xff]   ;;  %v1177_v30 = vld [vmem:[#allocation7 + $0x50] ss:$12 sps:$4 sm:$0xff]  }
  0x75   : > { %v1173_v28 = vld [vmem:[#allocation7 + $0x38] ss:$12 sps:$4 sm:$0xff]   ;;  %v1174_v29 = vld [vmem:[#allocation7 + $0x48] ss:$12 sps:$4 sm:$0xff]   ;;  %v1178_v32 = vld [vmem:[#allocation7 + $0x60] ss:$12 sps:$4 sm:$0xff]  }
  0x76   : > { %453 = vmatpush1.bf16.msra.mxu0 %v1151_v10  ;;  %496 = vmatpush1.bf16.msra.mxu1 %v1154_v13  ;;  %v1180_v31 = vld [vmem:[#allocation7 + $0x64] ss:$12 sps:$4 sm:$0xff]   ;;  %v1181_v33 = vld [vmem:[#allocation7 + $0x68] ss:$12 sps:$4 sm:$0xff]   ;;  %v1185_v36 = vld [vmem:[#allocation7 + $0x80] ss:$12 sps:$4 sm:$0xff]  }
  0x77   : > { %454 = vmatprep.subr.bf16.mxu0 %v1155_v12  ;;  %497 = vmatprep.subr.bf16.mxu1 %v1158_v14  ;;  %v1184_v34 = vld [vmem:[#allocation7 + $0x7c] ss:$12 sps:$4 sm:$0xff]   ;;  %v1182_v35 = vld [vmem:[#allocation7 + $0x78] ss:$12 sps:$4 sm:$0xff]   ;;  %v1188_v37 = vld [vmem:[#allocation7 + $0x94] ss:$12 sps:$4 sm:$0xff]  }
  0x78   : > { %v1186_v38 = vld [vmem:[#allocation7 + $0x90] ss:$12 sps:$4 sm:$0xff]   ;;  %v1189_v39 = vld [vmem:[#allocation7 + $0x98] ss:$12 sps:$4 sm:$0xff]   ;;  %v1190_v40 = vld [vmem:[#allocation7 + $0xa8] ss:$12 sps:$4 sm:$0xff]  }
  0x79   : > { %v1192_v41 = vld [vmem:[#allocation7 + $0xac] ss:$12 sps:$4 sm:$0xff]   ;;  %v1193_v42 = vld [vmem:[#allocation7 + $0xb0] ss:$12 sps:$4 sm:$0xff]   ;;  %v304_v45 = vadd.s32 8, %v1598_v44  ;;  %v309_v46 = vand.u32 15, %v1598_v44 }
  0x7a   : > { %455 = vmatpush1.bf16.msra.mxu0 %v1157_v15  ;;  %498 = vmatpush1.bf16.msra.mxu1 %v1160_v17  ;;  %v996_v54 = vld [vmem:[%s1687_s2] ss:$0 sm:$0xff]  ;;  %vm549_vm4 = vcmp.lt.s32.totalorder %v1598_v44, 1  ;;  %vm556_vm5 = vcmp.lt.s32.totalorder %v1598_v44, 7  ;;  %s974_s18 = sshll.u32 %s1574_s13, 4  ;;  %s1029_s7 = sshll.u32 %s1423_s25, 8 }
  0x7b   : > { %737 = vmatprep.subr.bf16.mxu0 %v1164_v16  ;;  %1039 = vmatprep.subr.bf16.mxu1 %v1362_v22  ;;  %v316_v47 = vand.u32 15, %v304_v45  ;;  %vm335_vm2 = vcmp.ne.s32.totalorder %v309_v46, 0  ;;  %s298_s30 = scalar_lea.vmem [#allocation8], %s974_s18  ;;  %s1639_s14 = scalar_lea.hbm %s1691_s6, %s1029_s7 }
  0x7c   : > { %v976_v49 = vsel %vm335_vm2, 1.0, %v1362_v22  ;;  %s870_s20 = sshll.u32 %s298_s30, 4  ;;  %s857_s25 = scalar_lea.sflag [#allocation4], %s1574_s13  ;;  %s1641_s20 = int_to_ptr.vmem [resolvable:$true] %s870_s20 }
  0x7d   : > { %994 = vmatmul.mubr.msk.bf16.vlgmr.msra.gmra.mrb[0].mxu0 %vm444_vm0, %v1161_v18  ;;  %995 = vmatmul.mubr.msk.bf16.vlgmr.msra.gmra.mrb[0].mxu1 %vm444_vm0, %v1161_v18  ;;  %vm330_vm3 = vcmp.ne.s32.totalorder %v316_v47, 15  ;;  %s1280_s8 = scalar_lea.vmem %s1641_s20, 256  ;;  %p1705_p0 = scmp.ne.s32.totalorder %s1700_s12, 0 }
  0x7e   : > { %738 = vmatpush1.bf16.msra.mxu0 %v1162_v19  ;;  %769 = vmatprep.mubr.bf16.mxu0 %v1361_v0  ;;  %v975_v50 = vsel %vm330_vm3, 1.0, %v1362_v22  ;;  %p1281_p11 = scmp.ne.s32.totalorder %s1641_s20, %s1280_s8  ;;  %s1364_s27 = smov [#allocation8]  }
  0x7f   : > { %739 = vmatprep.subr.bf16.mxu0 %v1168_v20  ;;  %1040 = vmatpush3.bf16.msra.mxu1 %v1165_v21  ;;  %s1284_s29 = sshll.u32 %s1364_s27, 4  ;;  %s1285_s29 = int_to_ptr.vmem [resolvable:$false] %s1284_s29 }
  0x80   : > { %1041 = vmatprep.subr.bf16.mxu1 %v1362_v22  ;;  %1055 = vmatprep.mubr.msk.bf16.mxu1 %vm1363_vm1, %v1362_v22  ;;  %p1282_p1 = pnand %p1281_p11, %p1705_p0  ;;  %s1286_s16 = scalar_lea.vmem %s1285_s29, 512 }
  0x81   : > { %p1287_p5 = scmp.lt.s32.totalorder %s1641_s20, %s1285_s29  ;;  %p1288_p9 = scmp.lt.s32.totalorder %s1286_s16, %s1280_s8 }
  0x82   : > { %740 = vmatpush1.bf16.msra.mxu0 %v1166_v23  ;;  %p1283_p3 = pneg %p1282_p1 }
  0x83   : > { %741 = vmatprep.subr.bf16.mxu0 %v1172_v25  ;;  %1042 = vmatpush3.bf16.msra.mxu1 %v1169_v24  ;;  %v1022_v24 = vld [vmem:[%s1689_s4] ss:$0 sm:$0xff]  ;;  %p1289_p12 = por %p1288_p9, %p1287_p5 }
  0x84   : > { %1043 = vmatprep.subr.bf16.mxu1 %v1362_v22 }
  0x85   : > { %p1290_p2 = pnand %p1289_p12, %p1283_p3 }
  0x86   : > { %742 = vmatpush1.bf16.msra.mxu0 %v1170_v26 }
  0x87   : > { %743 = vmatprep.subr.bf16.mxu0 %v1176_v27  ;;  %1044 = vmatpush3.bf16.msra.mxu1 %v1173_v28 }
  0x88   : > { %1045 = vmatprep.subr.bf16.mxu1 %v1362_v22 }
  0x8a   : > { %744 = vmatpush1.bf16.msra.mxu0 %v1174_v29 }
  0x8b   : > { %1046 = vmatpush3.bf16.msra.mxu1 %v1177_v30  ;;  %745 = vmatprep.subr.bf16.mxu0 %v1180_v31 }
  0x8c   : > { %1047 = vmatprep.subr.bf16.mxu1 %v1362_v22 }
  0x8e   : > { %746 = vmatpush1.bf16.msra.mxu0 %v1178_v32 }
  0x8f   : > { %1048 = vmatpush3.bf16.msra.mxu1 %v1181_v33  ;;  %747 = vmatprep.subr.bf16.mxu0 %v1184_v34 }
  0x90   : > { %1049 = vmatprep.subr.bf16.mxu1 %v1362_v22 }
  0x92   : > { %748 = vmatpush1.bf16.msra.mxu0 %v1182_v35 }
  0x93   : > { %1050 = vmatpush3.bf16.msra.mxu1 %v1185_v36  ;;  %749 = vmatprep.subr.bf16.mxu0 %v1188_v37 }
  0x94   : > { %1051 = vmatprep.subr.bf16.mxu1 %v1362_v22 }
  0x96   : > { %750 = vmatpush1.bf16.msra.mxu0 %v1186_v38 }
  0x97   : > { %1052 = vmatpush3.bf16.msra.mxu1 %v1189_v39  ;;  %751 = vmatprep.subr.bf16.mxu0 %v1192_v41  ;;  %v997_v39 = vld [vmem:[%s1690_s5] ss:$0 sm:$0xff] }
  0x98   : > { %1053 = vmatprep.subr.bf16.mxu1 %v1362_v22 }
  0x9a   : > { %752 = vmatpush1.bf16.msra.mxu0 %v1190_v40 }
  0x9b   : > { %1054 = vmatpush3.bf16.msra.mxu1 %v1193_v42 }
 0x150   : > { %v482_v48 = vpop.f32.mrb[0].mxu0  ;;  %v525_v52 = vpop.f32.mrb[0].mxu1 }
 0x151   : > { %v484_v51 = vpop.f32.mrb[1].mxu0  ;;  %v536_v55 = vmul.f32 %v976_v49, %v525_v52  ;;  %v1607_v57 = vpop.f32.mrb[1].mxu1  ;;  %v547_v60 = vrot.slane %v482_v48, 7 }
 0x152   : > { %v486_v53 = vpop.f32.mrb[2].mxu0  ;;  %v529_v59 = vpop.f32.mrb[2].mxu1  ;;  %v545_v1 = vadd.f32 %v996_v54, %v484_v51  ;;  %v574_v44 = vadd.f32 %v997_v39, %v1607_v57 }
 0x153   : > { %v535_v56 = vmul.f32 %v975_v50, %v486_v53  ;;  %v488_v58 = vpop.f32.mrb[3].mxu0  ;;  %v554_v61 = vrot.slane %v536_v55, 1  ;;  %v555_v63 = vrot.slane %v529_v59, 1  ;;  %v531_v0 = vpop.f32.mrb[3].mxu1 }
 0x154   : > { %v546_v2 = vadd.f32 %v996_v54, %v488_v58  ;;  %v575_v45 = vadd.f32 %v997_v39, %v531_v0 }
 0x155   : > { %v548_v62 = vrot.slane %v535_v56, 7  ;;  %v557_v5 = vsel %vm556_vm5, %v554_v61, %v555_v63  ;;  %v558_v6 = vsel %vm556_vm5, %v555_v63, %v554_v61 }
 0x157   : > { %v551_v3 = vsel %vm549_vm4, %v548_v62, %v547_v60  ;;  %v550_v4 = vsel %vm549_vm4, %v547_v60, %v548_v62 }
 0x158   : > { %v552_v7 = vadd.f32 %v551_v3, %v545_v1  ;;  %v553_v8 = vadd.f32 %v550_v4, %v546_v2 }
 0x15a   : > { %v559_v9 = vadd.f32 %v557_v5, %v552_v7  ;;  %v560_v10 = vadd.f32 %v558_v6, %v553_v8 }
 0x15c   : > { %vm561_vm6 = vcmp.gt.f32.partialorder %v559_v9, 0.0  ;;  %vm562_vm7 = vcmp.gt.f32.partialorder %v560_v10, 0.0  ;;  %v563_v11 = vmul.f32 0.1, %v559_v9  ;;  %v564_v12 = vmul.f32 0.1, %v560_v10 }
 0x15e   : > { %v565_v13 = vsel %vm561_vm6, %v559_v9, %v563_v11  ;;  %v566_v14 = vsel %vm562_vm7, %v560_v10, %v564_v12 }
 0x15f   : > { %v576_v15 = vpack.c.bf16 %v566_v14, %v565_v13 }
 0x161   : > { %770 = vmatmul.mubr.bf16.vlgmr.msra.gmra.mrb[4].mxu0 %v576_v15  ;;  %1056 = vmatmul.mubr.bf16.vlgmr.msra.gmra.mrb[4].mxu1 %v576_v15 }
 0x234   : > { %v771_v16 = vpop.f32.mrb[4].mxu0  ;;  %v814_v17 = vpop.f32.mrb[4].mxu1 }
 0x235   : > { %v823_v18 = vmul.f32 %v976_v49, %v814_v17  ;;  %v773_v19 = vpop.f32.mrb[5].mxu0  ;;  %v1057_v20 = vpop.f32.mrb[5].mxu1  ;;  %v834_v29 = vrot.slane %v771_v16, 7 }
 0x236   : > { %v775_v21 = vpop.f32.mrb[6].mxu0  ;;  %v817_v22 = vpop.f32.mrb[6].mxu1  ;;  %v832_v33 = vadd.f32 %v1022_v24, %v773_v19 }
 0x237   : > { %v840_v23 = vrot.slane %v823_v18, 1  ;;  %v822_v25 = vmul.f32 %v975_v50, %v775_v21  ;;  %v841_v26 = vrot.slane %v817_v22, 1  ;;  %v777_v27 = vpop.f32.mrb[7].mxu0  ;;  %v1058_v28 = vpop.f32.mrb[7].mxu1 }
 0x238   : > { %v833_v34 = vadd.f32 %v1022_v24, %v777_v27 }
 0x239   : > { %v835_v30 = vrot.slane %v822_v25, 7  ;;  %v842_v31 = vsel %vm556_vm5, %v840_v23, %v841_v26  ;;  %v843_v32 = vsel %vm556_vm5, %v841_v26, %v840_v23 }
 0x23b   : > { %v837_v35 = vsel %vm549_vm4, %v835_v30, %v834_v29  ;;  %v836_v36 = vsel %vm549_vm4, %v834_v29, %v835_v30 }
 0x23c   : > { %v838_v37 = vadd.f32 %v837_v35, %v832_v33  ;;  %v839_v38 = vadd.f32 %v836_v36, %v833_v34 }
 0x23e   : > { %v844_v40 = vadd.f32 %v842_v31, %v838_v37  ;;  %v845_v41 = vadd.f32 %v843_v32, %v839_v38 }
 0x240   : > { %vm846_vm8 = vcmp.gt.f32.partialorder %v844_v40, 0.0  ;;  %v848_v42 = vmul.f32 0.1, %v844_v40  ;;  %vm847_vm9 = vcmp.gt.f32.partialorder %v845_v41, 0.0  ;;  %v849_v43 = vmul.f32 0.1, %v845_v41 }
 0x242   : > { %v850_v46 = vsel %vm846_vm8, %v844_v40, %v848_v42  ;;  %v851_v47 = vsel %vm847_vm9, %v845_v41, %v849_v43 }
 0x243   : > { %v852_v48 = vadd.f32 %v850_v46, %v574_v44  ;;  %v853_v49 = vadd.f32 %v851_v47, %v575_v45 }
 0x245   : > { %855 = vst [vmem:[%s298_s30 + $0x8] sm:$0xff] %v853_v49  ;;  %854 = vst [vmem:[%s298_s30] sm:$0xff] %v852_v48 }
 0x246   : > { %1293 = shalt.err (!%p1290_p2)
}
 0x247   : > { %s1294_s17 = scalar_lea.hbm %s1639_s14, 256  ;;  %s1298_s15 = scalar_lea.hbm %s1691_s6, 512 }
 0x248   : > { %p1295_p13 = scmp.ne.s32.totalorder %s1639_s14, %s1294_s17  ;;  %p1299_p4 = scmp.lt.u32.totalorder %s1639_s14, %s1691_s6 }
 0x249   : > { %p1300_p7 = scmp.lt.u32.totalorder %s1298_s15, %s1294_s17  ;;  %p1302_p11 = scmp.lt.u32.totalorder %s1294_s17, %s1639_s14 }
 0x24a   : > { %p1296_p6 = pnand %p1295_p13, %p1705_p0 }
 0x24b   : > { %p1301_p8 = por %p1300_p7, %p1299_p4 }
 0x24c   : > { %p1297_p10 = pneg %p1296_p6 }
 0x24d   : > { %p1303_p1 = por %p1302_p11, %p1301_p8 }
 0x24f   : > { %p1304_p3 = pnand %p1303_p1, %p1297_p10 }
 0x251   : > { %1307 = shalt.err (!%p1304_p3)
}
 0x252   : > { %s1365_s9 = smov 128   ;;  %s1366_s10 = smov 8  }
 0x253   : > { %1069 = dma.vmem_to_hbm [thread:$0]  (%p1705_p0), %s1641_s20, 256, %s1639_s14, %s857_s25, %s1365_s9, %s1365_s9, %s1366_s10  }
 0x254 PF: > { %s885_s8 = sand.u32 1, %s1338_s21   ;;  %p1706_p5 = scmp.ne.s32.totalorder %s1696_s28, 0 }
 0x255   : > { %p1707_p9 = scmp.ge.s32.totalorder %s1350_s24, 2  ;;  %s886_s27 = scalar_lea.sflag [#allocation4], %s885_s8 }
 0x257   : > { %p1083_p12 = pnand %p1707_p9, %p1706_p5 }
 0x259   : > { %1333 = dma.done.wait (!%p1083_p12), %s886_s27, 256  }
 0x25a   : > { %1335 = vsyncadd (!%p1083_p12), %s886_s27, 4294967040  ;;  %p20_p2 = scmp.ge.s32.totalorder %s1512_s26, 4   ;;  %s1708_s21 = smov %s1342_s22 }
 0x25b   : > { %s1709_s22 = smov %s1346_s23  ;;  %s1710_s23 = smov %s1521_s11 }
 0x25c   : > { %s1711_s24 = smov %s1512_s26  ;;  %22 = sbr.rel (!%p20_p2) target bundleno = 6 (0x6), region = 97 }
 0x263   :  { %891 = vsyncpa [#allocation3], 1 }
 0x264   :  { %893 = vsyncpa [#allocation3 + $0x1], 1 }
 0x265   :  { %894 = vsyncpa [#allocation6], 1 }
 0x266   :  { %895 = vsyncpa [#allocation4], 1 }
 0x267   :  { %897 = vsyncpa [#allocation4 + $0x1], 1 }

</bundles_post_ra>
